<compile_context>
chip_gen: v5e
topology: v5e:2x2
jax: 0.10.0
libtpu: 0.0.40
codegen_flags: <defaults>
</compile_context>

<pallas_src>
import jax
import jax.numpy as jnp
from jax.experimental import pallas as pl
from jax.experimental.pallas import tpu as pltpu


def _mlp_kernel(x_ref, w1_ref, b1_ref, w2_ref, b2_ref, out_ref):
    """Fused Linear -> GELU (tanh approx) -> Linear on one [TM, H] token tile."""
    x = x_ref[...]                                   # [TM, H]  bf16
    w1 = w1_ref[...]                                 # [H,  F]  bf16 (resident)
    w2 = w2_ref[...]                                 # [F,  H]  bf16 (resident)

    # First projection on the MXU: bf16 operands, f32 accumulation.
    h = jnp.dot(x, w1, preferred_element_type=jnp.float32)        # [TM, F] f32
    h = h + b1_ref[...].astype(jnp.float32)                       # bias once/tile

    # GELU, tanh approximation (EUP path), matching torch.nn.GELU('tanh').
    h = jax.nn.gelu(h, approximate=True)

    # Second projection: cast activation back to bf16 for the MXU fast path.
    y = jnp.dot(h.astype(jnp.bfloat16), w2,
                preferred_element_type=jnp.float32)               # [TM, H] f32
    y = y + b2_ref[...].astype(jnp.float32)

    out_ref[...] = y.astype(out_ref.dtype)


def nxd_model_forward(x, w1, b1, w2, b2, *, tm=128):
    """Mimics NxDModel.forward (pure delegation to the wrapped MLP).

    x : [batch, seq, hidden] (bf16)  ->  returns [batch, seq, hidden] (bf16)
    w1: [H, F], b1: [1, F], w2: [F, H], b2: [1, H]   (nn.Linear weights,
    pre-transposed to [in_features, out_features]).
    """
    B, S, H = x.shape
    F = w1.shape[1]
    T = B * S
    x2d = x.reshape(T, H)                            # glue: flatten token dims

    # Pad the token dim up to a multiple of the tile so the grid is exact.
    num_tiles = pl.cdiv(T, tm)
    t_pad = num_tiles * tm
    if t_pad != T:
        x2d = jnp.pad(x2d, ((0, t_pad - T), (0, 0)))

    out2d = pl.pallas_call(
        _mlp_kernel,
        out_shape=jax.ShapeDtypeStruct((t_pad, H), x.dtype),
        grid_spec=pltpu.PrefetchScalarGridSpec(
            num_scalar_prefetch=0,
            grid=(num_tiles,),
            in_specs=[
                # x tile streams over the token axis (double-buffered by Pallas).
                pl.BlockSpec((tm, H), lambda i: (i, 0)),
                # Weights / biases: same block every iteration -> VMEM-resident.
                pl.BlockSpec((H, F), lambda i: (0, 0)),
                pl.BlockSpec((1, F), lambda i: (0, 0)),
                pl.BlockSpec((F, H), lambda i: (0, 0)),
                pl.BlockSpec((1, H), lambda i: (0, 0)),
            ],
            out_specs=pl.BlockSpec((tm, H), lambda i: (i, 0)),
        ),
        compiler_params=pltpu.CompilerParams(
            # Token tiles are independent -> shard across TCs on v7x megacore.
            dimension_semantics=("parallel",),
        ),
    )(x2d, w1, b1, w2, b2)

    if t_pad != T:
        out2d = out2d[:T]
    return out2d.reshape(B, S, H)


if __name__ == "__main__":
    key = jax.random.PRNGKey(0)
    # Small but lane-dense shapes: hidden/ffn are multiples of 128 so every
    # vector store is full-width; token dim 256 gives a 2-step pipelined grid.
    B, S, H, F = 2, 128, 128, 256
    TM = 128

    k_x, k_w1, k_b1, k_w2, k_b2 = jax.random.split(key, 5)
    x = jax.random.normal(k_x, (B, S, H), dtype=jnp.float32).astype(jnp.bfloat16)
    # Deterministic parameter init (synthetic; shapes from the wrapped MLP).
    w1 = (jax.random.normal(k_w1, (H, F), dtype=jnp.float32) * 0.05).astype(jnp.bfloat16)
    b1 = (jax.random.normal(k_b1, (1, F), dtype=jnp.float32) * 0.01).astype(jnp.bfloat16)
    w2 = (jax.random.normal(k_w2, (F, H), dtype=jnp.float32) * 0.05).astype(jnp.bfloat16)
    b2 = (jax.random.normal(k_b2, (1, H), dtype=jnp.float32) * 0.01).astype(jnp.bfloat16)

    y = nxd_model_forward(x, w1, b1, w2, b2, tm=TM)
    jax.block_until_ready(y)

    # Plain-JAX reference of the same forward (f32 math on the bf16 params).
    def ref(x2d):
        xf = x2d.astype(jnp.float32)
        h = xf @ w1.astype(jnp.float32) + b1.astype(jnp.float32)
        h = jax.nn.gelu(h, approximate=True)
        return h @ w2.astype(jnp.float32) + b2.astype(jnp.float32)

    y_ref = ref(x.reshape(B * S, H)).reshape(B, S, H)
    assert jnp.allclose(y.astype(jnp.float32), y_ref, atol=3e-2, rtol=3e-2), (
        float(jnp.max(jnp.abs(y.astype(jnp.float32) - y_ref))))

    print("KERNEL_OK")
</pallas_src>

<mosaic_0001>
module attributes {stable_mosaic.version = 11 : i64} {
  func.func @_mlp_kernel(%arg0: i32, %arg1: memref<128x128xbf16, #tpu.memory_space<vmem>>, %arg2: memref<128x256xbf16, #tpu.memory_space<vmem>>, %arg3: memref<1x256xbf16, #tpu.memory_space<vmem>>, %arg4: memref<256x128xbf16, #tpu.memory_space<vmem>>, %arg5: memref<1x128xbf16, #tpu.memory_space<vmem>>, %arg6: memref<128x128xbf16, #tpu.memory_space<vmem>>) attributes {dimension_semantics = [#tpu.dimension_semantics<parallel>], iteration_bounds = array<i64: 2>, scalar_prefetch = 0 : i64, scratch_operands = 0 : i64, tpu.core_type = #tpu.core_type<tc>, window_params = [{transform_indices = @transform_0, window_bounds = array<i64: 128, 128>}, {pipeline_mode = #tpu.pipeline_mode<synchronous>, transform_indices = @transform_1, window_bounds = array<i64: 128, 256>}, {pipeline_mode = #tpu.pipeline_mode<synchronous>, transform_indices = @transform_2, window_bounds = array<i64: 1, 256>}, {pipeline_mode = #tpu.pipeline_mode<synchronous>, transform_indices = @transform_3, window_bounds = array<i64: 256, 128>}, {pipeline_mode = #tpu.pipeline_mode<synchronous>, transform_indices = @transform_4, window_bounds = array<i64: 1, 128>}, {transform_indices = @transform_5, window_bounds = array<i64: 128, 128>}]} {
    %c0 = arith.constant 0 : index
    %c0_0 = arith.constant 0 : index
    %0 = vector.load %arg1[%c0, %c0_0] : memref<128x128xbf16, #tpu.memory_space<vmem>>, vector<128x128xbf16>
    %c0_1 = arith.constant 0 : index
    %c0_2 = arith.constant 0 : index
    %1 = vector.load %arg2[%c0_1, %c0_2] : memref<128x256xbf16, #tpu.memory_space<vmem>>, vector<128x256xbf16>
    %c0_3 = arith.constant 0 : index
    %c0_4 = arith.constant 0 : index
    %2 = vector.load %arg4[%c0_3, %c0_4] : memref<256x128xbf16, #tpu.memory_space<vmem>>, vector<256x128xbf16>
    %cst = arith.constant dense<0.000000e+00> : vector<128x256xf32>
    %3 = tpu.matmul %0, %1, %cst {dimension_numbers = #tpu.dot_dimension_numbers<[1], [0], [0], [1], [0, 0, 1, 1], [], []>} : vector<128x128xbf16>, vector<128x256xbf16>, vector<128x256xf32> -> vector<128x256xf32>
    %c0_5 = arith.constant 0 : index
    %c0_6 = arith.constant 0 : index
    %4 = vector.load %arg3[%c0_5, %c0_6] : memref<1x256xbf16, #tpu.memory_space<vmem>>, vector<1x256xbf16>
    %5 = arith.extf %4 : vector<1x256xbf16> to vector<1x256xf32>
    %6 = vector.broadcast %5 : vector<1x256xf32> to vector<128x256xf32>
    %7 = arith.addf %3, %6 : vector<128x256xf32>
    %8 = arith.mulf %7, %7 : vector<128x256xf32>
    %9 = arith.mulf %7, %8 : vector<128x256xf32>
    %cst_7 = arith.constant 4.471500e-02 : f32
    %10 = vector.broadcast %cst_7 : f32 to vector<128x256xf32>
    %11 = arith.mulf %10, %9 : vector<128x256xf32>
    %12 = arith.addf %7, %11 : vector<128x256xf32>
    %cst_8 = arith.constant 0.797884583 : f32
    %13 = vector.broadcast %cst_8 : f32 to vector<128x256xf32>
    %14 = arith.mulf %13, %12 : vector<128x256xf32>
    %15 = math.tanh %14 : vector<128x256xf32>
    %cst_9 = arith.constant 1.000000e+00 : f32
    %16 = vector.broadcast %cst_9 : f32 to vector<128x256xf32>
    %17 = arith.addf %16, %15 : vector<128x256xf32>
    %cst_10 = arith.constant 5.000000e-01 : f32
    %18 = vector.broadcast %cst_10 : f32 to vector<128x256xf32>
    %19 = arith.mulf %18, %17 : vector<128x256xf32>
    %20 = arith.mulf %7, %19 : vector<128x256xf32>
    %21 = arith.truncf %20 : vector<128x256xf32> to vector<128x256xbf16>
    %cst_11 = arith.constant dense<0.000000e+00> : vector<128x128xf32>
    %22 = tpu.matmul %21, %2, %cst_11 {dimension_numbers = #tpu.dot_dimension_numbers<[1], [0], [0], [1], [0, 0, 1, 1], [], []>} : vector<128x256xbf16>, vector<256x128xbf16>, vector<128x128xf32> -> vector<128x128xf32>
    %c0_12 = arith.constant 0 : index
    %c0_13 = arith.constant 0 : index
    %23 = vector.load %arg5[%c0_12, %c0_13] : memref<1x128xbf16, #tpu.memory_space<vmem>>, vector<1x128xbf16>
    %24 = arith.extf %23 : vector<1x128xbf16> to vector<1x128xf32>
    %25 = vector.broadcast %24 : vector<1x128xf32> to vector<128x128xf32>
    %26 = arith.addf %22, %25 : vector<128x128xf32>
    %27 = arith.truncf %26 : vector<128x128xf32> to vector<128x128xbf16>
    %c0_14 = arith.constant 0 : index
    %c0_15 = arith.constant 0 : index
    %28 = vector.load %arg6[%c0_14, %c0_15] : memref<128x128xbf16, #tpu.memory_space<vmem>>, vector<128x128xbf16>
    tpu.vector_store %arg6[%c0_14, %c0_15], %27 {strides = array<i32>} : memref<128x128xbf16, #tpu.memory_space<vmem>>, vector<128x128xbf16>,
    return
  }
  func.func @transform_0(%arg0: i32) -> (i32, i32) {
    %c0_i32 = arith.constant 0 : i32
    %c0_i32_0 = arith.constant 0 : i32
    return %arg0, %c0_i32 : i32, i32
  }
  func.func @transform_1(%arg0: i32) -> (i32, i32) {
    %c0_i32 = arith.constant 0 : i32
    %c0_i32_0 = arith.constant 0 : i32
    %c0_i32_1 = arith.constant 0 : i32
    return %c0_i32, %c0_i32_0 : i32, i32
  }
  func.func @transform_2(%arg0: i32) -> (i32, i32) {
    %c0_i32 = arith.constant 0 : i32
    %c0_i32_0 = arith.constant 0 : i32
    %c0_i32_1 = arith.constant 0 : i32
    return %c0_i32, %c0_i32_0 : i32, i32
  }
  func.func @transform_3(%arg0: i32) -> (i32, i32) {
    %c0_i32 = arith.constant 0 : i32
    %c0_i32_0 = arith.constant 0 : i32
    %c0_i32_1 = arith.constant 0 : i32
    return %c0_i32, %c0_i32_0 : i32, i32
  }
  func.func @transform_4(%arg0: i32) -> (i32, i32) {
    %c0_i32 = arith.constant 0 : i32
    %c0_i32_0 = arith.constant 0 : i32
    %c0_i32_1 = arith.constant 0 : i32
    return %c0_i32, %c0_i32_0 : i32, i32
  }
  func.func @transform_5(%arg0: i32) -> (i32, i32) {
    %c0_i32 = arith.constant 0 : i32
    %c0_i32_0 = arith.constant 0 : i32
    return %arg0, %c0_i32 : i32, i32
  }
}

</mosaic_0001>

<bundles_post_ra>
// kernel: tpu_custom_call.1
= control target key start
LH: loop header
LB: loop body
LE: loop exit
PB: predicated region body
PF: predicated region fallthrough
CT: control target
= control target key end

     0   :  { %10 = vsyncpa [#allocation3], 0  ;;  %s2338_s0 = inlined_call_operand.hbm [shape: bf16[256,128], index: 0, kind: input, shape index: {}]   ;;  %s2339_s1 = inlined_call_operand.hbm [shape: bf16[128,256], index: 1, kind: input, shape index: {}]   ;;  %s2340_s2 = inlined_call_operand.hbm [shape: bf16[1,256], index: 2, kind: input, shape index: {}]   ;;  %s2341_s3 = inlined_call_operand.hbm [shape: bf16[256,128], index: 3, kind: input, shape index: {}]   ;;  %s2342_s4 = inlined_call_operand.vmem [shape: bf16[1,128], index: 4, kind: input, shape index: {}]   ;;  %s2343_s5 = inlined_call_operand.hbm [shape: bf16[256,128], index: 5, kind: output, shape index: {}]  }
   0x1   :  { %12 = vsyncpa [#allocation3 + $0x1], 0 }
   0x2   :  { %13 = vsyncpa [#allocation6], 0 }
   0x3   :  { %14 = vsyncpa [#allocation9], 0 }
   0x4   :  { %15 = vsyncpa [#allocation4], 0 }
   0x5   :  { %17 = vsyncpa [#allocation4 + $0x1], 0  ;;  %s1896_s18 = smov 0   ;;  %s1898_s19 = smov 0  }
   0x6   :  { %s1900_s20 = smov 0   ;;  %s1902_s21 = smov 0  }
   0x7 LB: > { %s1917_s22 = sadd.s32 4294967295, %s1855_s21   ;;  %s1245_s23 = sadd.s32 4294967294, %s1855_s21   ;;  %s1855_s21 = sphi %s1902_s21, %s2356_s21   ;;  %s1851_s20 = sphi %s1900_s20, %s2355_s20   ;;  %s1847_s19 = sphi %s1898_s19, %s2354_s19   ;;  %s1843_s18 = sphi %s1896_s18, %s2353_s18  }
   0x8   : > { %p43_p0 = scmp.ne.s32.totalorder %s1847_s19, %s1843_s18  ;;  %p44_p1 = scmp.eq.s32.totalorder %s1917_s22, 0 }
   0x9   : > { %p151_p2 = scmp.eq.s32.totalorder %s1917_s22, 1  ;;  %p157_p3 = scmp.eq.s32.totalorder %s1245_s23, 1 }
   0xa   : > { %p1926_p4 = por %p44_p1, %p43_p0  ;;  %p1246_p5 = scmp.ge.s32.totalorder %s1855_s21, 1 }
   0xb   : > { %p1931_p6 = por %p157_p3, %p43_p0  ;;  %p164_p7 = scmp.lt.s32.totalorder %s1855_s21, 3 }
   0xc   : > { %s175_s28 = sshll.u32 %s2339_s1, 4  ;;  %s1857_s30 = smov [#allocation5]   ;;  %s176_s28 = int_to_ptr.hbm [resolvable:$true] %s175_s28 }
   0xd   : > { %p1939_p8 = pnand %p1246_p5, %p164_p7  ;;  %s177_s6 = sshll.u32 %s1857_s30, 4  ;;  %s178_s6 = int_to_ptr.vmem [resolvable:$true] %s177_s6 }
   0xe   : > { %s190_s10 = sshll.u32 %s2340_s2, 4  ;;  %s1858_s11 = smov 128   ;;  %s191_s10 = int_to_ptr.hbm [resolvable:$true] %s190_s10 }
   0xf   : > { %p1530_p9 = pneg %p1939_p8  ;;  %s1859_s12 = smov 8  }
  0x10   : > { %s1860_s13 = smov [#allocation7]   ;;  %s201_s17 = sshll.u32 %s2341_s3, 4  ;;  %s202_s17 = int_to_ptr.hbm [resolvable:$true] %s201_s17 }
  0x11   : > { %p1947_p10 = pnand %p1530_p9, %p44_p1  ;;  %s192_s14 = sshll.u32 %s1860_s13, 4  ;;  %s193_s14 = int_to_ptr.vmem [resolvable:$true] %s192_s14 }
  0x12   : > { %s1861_s23 = smov [#allocation8]   ;;  %s2344_s27 = smov 64  }
  0x13   : > { %1533 = dma.hbm_to_vmem [thread:$0]  (!%p1947_p10), %s176_s28, 2048, %s178_s6, [#allocation6], %s1858_s11, %s1858_s11, %s1859_s12  }
  0x14   : > { %1536 = dma.hbm_to_vmem [thread:$0]  (!%p1947_p10), %s191_s10, 32, %s193_s14, [#allocation6]  }
  0x15   : > { %s203_s26 = sshll.u32 %s1861_s23, 4  ;;  %s1863_s28 = smov 4   ;;  %s204_s26 = int_to_ptr.vmem [resolvable:$true] %s203_s26 }
  0x16   : > { %1539 = dma.hbm_to_vmem [thread:$0]  (!%p1947_p10), %s202_s17, 2048, %s204_s26, [#allocation9], %s2344_s27, %s2344_s27, %s1863_s28  }
  0x17   : > { %s1968_s30 = sadd.s32 1, %s1855_s21   ;;  %s30_s8 = sadd.s32 1, %s1851_s20 }
  0x18   : > { %s27_s6 = ssub.s32 %s1855_s21, %s1968_s30  ;;  %p37_p13 = scmp.ne.s32.totalorder %s1851_s20, %s1847_s19 }
  0x19   : > { %p28_p12 = scmp.eq.s32.totalorder %s27_s6, 0  ;;  %p38_p0 = scmp.eq.s32.totalorder %s1855_s21, 0 }
  0x1a   : > { %p1981_p3 = por %p151_p2, %p37_p13  ;;  %p1551_p5 = scmp.lt.s32.totalorder %s1855_s21, 2 }
  0x1b   : > { %s1977_s9 = scalar_select %p28_p12, %s1851_s20, %s30_s8  }
  0x1c   : > { %s220_s7 = sand.u32 1, %s1851_s20   ;;  %s1425_s11 = sshll.u32 %s1855_s21, 6 }
  0x1d   : > { %p39_p7 = por %p38_p0, %p37_p13  ;;  %s1251_s12 = sshll.u32 %s220_s7, 6 }
  0x1e   : > { %s229_s15 = scalar_lea.hbm %s2338_s0, %s1425_s11  ;;  %s224_s17 = scalar_lea.vmem [#allocation2], %s1251_s12 }
  0x1f   : > { %s230_s16 = sshll.u32 %s229_s15, 4  ;;  %s232_s23 = sshll.u32 %s224_s17, 4  ;;  %s231_s16 = int_to_ptr.hbm [resolvable:$true] %s230_s16  ;;  %s233_s23 = int_to_ptr.vmem [resolvable:$true] %s232_s23 }
  0x20   : > { %p1991_p9 = pnand %p1551_p5, %p39_p7  ;;  %s221_s6 = scalar_lea.sflag [#allocation3], %s220_s7 }
  0x21   : > { %s1751_s8 = sshra.s32 %s231_s16, 4  ;;  %s1758_s12 = scalar_lea.hbm %s2338_s0, 128  ;;  %s1752_s8 = int_to_ptr.hbm [resolvable:$true] %s1751_s8 }
  0x22   : > { %s1753_s27 = scalar_lea.hbm %s1752_s8, 64  ;;  %p1755_p10 = pneg %p1991_p9 }
  0x23   : > { %p1754_p2 = scmp.ne.s32.totalorder %s1752_s8, %s1753_s27  ;;  %p1759_p0 = scmp.lt.s32.totalorder %s1752_s8, %s2338_s0 }
  0x24   : > { %p1760_p5 = scmp.lt.s32.totalorder %s1758_s12, %s1753_s27 }
  0x25   : > { %p1756_p12 = pnand %p1755_p10, %p1754_p2 }
  0x26   : > { %p1761_p7 = por %p1760_p5, %p1759_p0 }
  0x27   : > { %p1757_p13 = pneg %p1756_p12 }
  0x29   : > { %p1762_p11 = pnand %p1761_p7, %p1757_p13 }
  0x2b   : > { %1765 = shalt.err (!%p1762_p11)
}
  0x2c   : > { %s2351_s7 = smov 64   ;;  %244 = sbr.rel (%p1939_p8) target bundleno = 511 (0x1ff), region = 40 }
  0x2d   : > { %1543 = dma.hbm_to_vmem [thread:$0]  (!%p1991_p9), %s231_s16, 1024, %s233_s23, %s221_s6, %s2351_s7, %s2351_s7, %s1863_s28  }
  0x2e   : > { %s2011_s17 = sand.u32 (!%p1939_p8), 1, %s1847_s19  }
  0x2f   : > { %s1255_s27 = sshll.u32 (!%p1939_p8), %s2011_s17, 6  ;;  %s247_s8 = scalar_lea.sflag (!%p1939_p8), [#allocation3], %s2011_s17 }
  0x30   : > { %s2017_s11 = scalar_lea.vmem (!%p1939_p8), [#allocation2], %s1255_s27 }
  0x31   : > { %1826 = dma.done.wait (%p1926_p4), %s247_s8, 1024  }
  0x32   : > { %1828 = vsyncadd (%p1926_p4), %s247_s8, 4294966272 }
  0x33   : > { %1830 = dma.done.wait (%p44_p1), [#allocation6], 2080  }
  0x34   : > { %1832 = vsyncadd (%p44_p1), [#allocation6], 4294965216 }
  0x35   : > { %1834 = dma.done.wait (%p44_p1), [#allocation9], 2048  }
  0x36   : > { %1836 = vsyncadd (%p44_p1), [#allocation9], 4294965248  ;;  %v1350_v0 = vld [vmem:[#allocation5 + $0x70] sm:$0xf]  ;;  %v1449_v1 = vld [vmem:[#allocation5 + $0x74] sm:$0xf0] }
  0x37   : > { %v1448_v2 = vld [vmem:[#allocation5 + $0x74] sm:$0xf]  ;;  %v1351_v3 = vor.u32 %v1449_v1, %v1350_v0  ;;  %v1352_v4 = vld [vmem:[#allocation5 + $0x78] sm:$0xf0]  ;;  %v1342_v5 = vld [vmem:[#allocation5 + $0x60] sm:$0xf] }
  0x38   : > { %v1447_v6 = vld [vmem:[#allocation5 + $0x64] sm:$0xf0]  ;;  %v1355_v7 = vor.u32 %v1448_v2, %v1352_v4  ;;  %v1446_v8 = vld [vmem:[#allocation5 + $0x64] sm:$0xf]  ;;  %v1344_v9 = vld [vmem:[#allocation5 + $0x68] sm:$0xf0] }
  0x39   : > { %496 = vmatpush.bf16.msra.mxu0 %v1351_v3  ;;  %v1343_v10 = vor.u32 %v1447_v6, %v1342_v5  ;;  %v1347_v11 = vor.u32 %v1446_v8, %v1344_v9  ;;  %v1334_v12 = vld [vmem:[#allocation5 + $0x50] sm:$0xf]  ;;  %v1445_v13 = vld [vmem:[#allocation5 + $0x54] sm:$0xf0]  ;;  %v1444_v14 = vld [vmem:[#allocation5 + $0x54] sm:$0xf] }
  0x3a   : > { %545 = vmatpush.bf16.msra.mxu1 %v1355_v7  ;;  %v1336_v15 = vld [vmem:[#allocation5 + $0x58] sm:$0xf0]  ;;  %v1335_v16 = vor.u32 %v1445_v13, %v1334_v12  ;;  %v1326_v18 = vld [vmem:[#allocation5 + $0x40] sm:$0xf]  ;;  %v1443_v19 = vld [vmem:[#allocation5 + $0x44] sm:$0xf0] }
  0x3b   : > { %v1339_v17 = vor.u32 %v1444_v14, %v1336_v15  ;;  %v1442_v20 = vld [vmem:[#allocation5 + $0x44] sm:$0xf]  ;;  %v1328_v21 = vld [vmem:[#allocation5 + $0x48] sm:$0xf0]  ;;  %v1327_v22 = vor.u32 %v1443_v19, %v1326_v18  ;;  %v1318_v24 = vld [vmem:[#allocation5 + $0x30] sm:$0xf] }
  0x3c   : > { %v1331_v23 = vor.u32 %v1442_v20, %v1328_v21  ;;  %v1441_v25 = vld [vmem:[#allocation5 + $0x34] sm:$0xf0]  ;;  %v1440_v26 = vld [vmem:[#allocation5 + $0x34] sm:$0xf]  ;;  %v1320_v27 = vld [vmem:[#allocation5 + $0x38] sm:$0xf0] }
  0x3d   : > { %497 = vmatpush.bf16.msra.mxu0 %v1343_v10  ;;  %v1319_v28 = vor.u32 %v1441_v25, %v1318_v24  ;;  %v1323_v29 = vor.u32 %v1440_v26, %v1320_v27  ;;  %v1310_v30 = vld [vmem:[#allocation5 + $0x20] sm:$0xf]  ;;  %v1439_v31 = vld [vmem:[#allocation5 + $0x24] sm:$0xf0]  ;;  %v1438_v32 = vld [vmem:[#allocation5 + $0x24] sm:$0xf] }
  0x3e   : > { %546 = vmatpush.bf16.msra.mxu1 %v1347_v11  ;;  %v1312_v33 = vld [vmem:[#allocation5 + $0x28] sm:$0xf0]  ;;  %v1311_v34 = vor.u32 %v1439_v31, %v1310_v30  ;;  %v1302_v36 = vld [vmem:[#allocation5 + $0x10] sm:$0xf]  ;;  %v1437_v37 = vld [vmem:[#allocation5 + $0x14] sm:$0xf0] }
  0x3f   : > { %v1315_v35 = vor.u32 %v1438_v32, %v1312_v33  ;;  %v1436_v38 = vld [vmem:[#allocation5 + $0x14] sm:$0xf]  ;;  %v1304_v39 = vld [vmem:[#allocation5 + $0x18] sm:$0xf0]  ;;  %v1303_v40 = vor.u32 %v1437_v37, %v1302_v36  ;;  %v1294_v42 = vld [vmem:[#allocation5] sm:$0xf] }
  0x40   : > { %v1307_v41 = vor.u32 %v1436_v38, %v1304_v39  ;;  %v1435_v43 = vld [vmem:[#allocation5 + $0x4] sm:$0xf0]  ;;  %v1434_v44 = vld [vmem:[#allocation5 + $0x4] sm:$0xf]  ;;  %v1296_v45 = vld [vmem:[#allocation5 + $0x8] sm:$0xf0] }
  0x41   : > { %498 = vmatpush.bf16.msra.mxu0 %v1335_v16  ;;  %v1295_v46 = vor.u32 %v1435_v43, %v1294_v42  ;;  %v1299_v47 = vor.u32 %v1434_v44, %v1296_v45  ;;  %v1426_v48 = vld [vmem:[%s2017_s11] sm:$0xff]  ;;  %v1427_v49 = vld [vmem:[%s2017_s11 + $0x8] sm:$0xff]  ;;  %v1428_v50 = vld [vmem:[%s2017_s11 + $0x10] sm:$0xff]  ;;  %s2280_s28 = scalar_lea.vmem [#allocation10], %s1255_s27  ;;  %s1466_s16 = sshll.u32 %s1917_s22, 6 }
  0x42   : > { %547 = vmatpush.bf16.msra.mxu1 %v1339_v17  ;;  %v1429_v51 = vld [vmem:[%s2017_s11 + $0x18] sm:$0xff]  ;;  %v1430_v52 = vld [vmem:[%s2017_s11 + $0x20] sm:$0xff]  ;;  %v1431_v53 = vld [vmem:[%s2017_s11 + $0x28] sm:$0xff]  ;;  %s1139_s6 = scalar_lea.hbm %s2343_s5, %s1466_s16  ;;  %s1140_s13 = sshll.u32 %s2280_s28, 4  ;;  %s1141_s13 = int_to_ptr.vmem [resolvable:$true] %s1140_s13 }
  0x43   : > { %v1432_v54 = vld [vmem:[%s2017_s11 + $0x30] sm:$0xff]  ;;  %v1457_v55 = vld [vmem:[#allocation8 + $0x38] sm:$0xff]  ;;  %v1454_v62 = vld [vmem:[#allocation8 + $0x20] sm:$0xff]  ;;  %s1142_s12 = sshll.u32 %s1139_s6, 4  ;;  %s1128_s22 = scalar_lea.sflag [#allocation4], %s2011_s17  ;;  %s1143_s12 = int_to_ptr.hbm [resolvable:$true] %s1142_s12 }
  0x44   : > { %v1465_v56 = vld [vmem:[#allocation8 + $0x78] sm:$0xff]  ;;  %997 = vmatpush.bf16.msra.mxu2 %v1457_v55  ;;  %v1456_v57 = vld [vmem:[#allocation8 + $0x30] sm:$0xff]  ;;  %v1455_v59 = vld [vmem:[#allocation8 + $0x28] sm:$0xff]  ;;  %s1795_s14 = sshra.s32 %s1143_s12, 4  ;;  %s1801_s8 = scalar_lea.hbm %s2343_s5, 128  ;;  %s1796_s14 = int_to_ptr.hbm [resolvable:$true] %s1795_s14 }
  0x45   : > { %499 = vmatpush.bf16.msra.mxu0 %v1327_v22  ;;  %1046 = vmatpush.bf16.msra.mxu3 %v1465_v56  ;;  %v1464_v58 = vld [vmem:[#allocation8 + $0x70] sm:$0xff]  ;;  %v1463_v60 = vld [vmem:[#allocation8 + $0x68] sm:$0xff]  ;;  %v1462_v63 = vld [vmem:[#allocation8 + $0x60] sm:$0xff]  ;;  %s1797_s15 = scalar_lea.hbm %s1796_s14, 64  ;;  %p1802_p11 = scmp.lt.s32.totalorder %s1796_s14, %s2343_s5 }
  0x46   : > { %548 = vmatpush.bf16.msra.mxu1 %v1331_v23  ;;  %v1433_v61 = vld [vmem:[%s2017_s11 + $0x38] sm:$0xff]  ;;  %v359_v0 = vld [vmem:[#allocation7] sm:$0x3]  ;;  %v1451_v8 = vld [vmem:[#allocation8 + $0x8] sm:$0xff]  ;;  %p1798_p1 = scmp.ne.s32.totalorder %s1796_s14, %s1797_s15  ;;  %p1803_p9 = scmp.lt.s32.totalorder %s1801_s8, %s1797_s15 }
  0x47   : > { %v1453_v1 = vld [vmem:[#allocation8 + $0x18] sm:$0xff]  ;;  %v360_v3 = vunpack.c.l.bf16 %v359_v0  ;;  %v1452_v4 = vld [vmem:[#allocation8 + $0x10] sm:$0xff]  ;;  %v1459_v9 = vld [vmem:[#allocation8 + $0x48] sm:$0xff] }
  0x48   : > { %998 = vmatpush.bf16.msra.mxu2 %v1456_v57  ;;  %v1461_v2 = vld [vmem:[#allocation8 + $0x58] sm:$0xff]  ;;  %v1460_v5 = vld [vmem:[#allocation8 + $0x50] sm:$0xff]  ;;  %v1450_v13 = vld [vmem:[#allocation8] sm:$0xff]  ;;  %p1799_p4 = pnand %p1798_p1, %p1981_p3  ;;  %p1804_p2 = por %p1803_p9, %p1802_p11 }
  0x49   : > { %500 = vmatpush.bf16.msra.mxu0 %v1319_v28  ;;  %1047 = vmatpush.bf16.msra.mxu3 %v1464_v58  ;;  %v362_v6 = vperm.slane %v360_v3, 0  ;;  %v363_v7 = vperm.slane %v360_v3, 2  ;;  %v1458_v14 = vld [vmem:[#allocation8 + $0x40] sm:$0xff] }
  0x4a   : > { %549 = vmatpush.bf16.msra.mxu1 %v1323_v29  ;;  %p1800_p8 = pneg %p1799_p4 }
  0x4b   : > { %v2039_v10 = vperm.slane %v362_v6, 0  ;;  %v2041_v11 = vperm.slane %v363_v7, 0 }
  0x4c   : > { %999 = vmatpush.bf16.msra.mxu2 %v1455_v59  ;;  %p1805_p10 = pnand %p1804_p2, %p1800_p8 }
  0x4d   : > { %501 = vmatpush.bf16.msra.mxu0 %v1311_v34  ;;  %1048 = vmatpush.bf16.msra.mxu3 %v1463_v60 }
  0x4e   : > { %550 = vmatpush.bf16.msra.mxu1 %v1315_v35 }
  0x50   : > { %1000 = vmatpush.bf16.msra.mxu2 %v1454_v62 }
  0x51   : > { %502 = vmatpush.bf16.msra.mxu0 %v1303_v40  ;;  %1049 = vmatpush.bf16.msra.mxu3 %v1462_v63 }
  0x52   : > { %551 = vmatpush.bf16.msra.mxu1 %v1307_v41 }
  0x54   : > { %1001 = vmatpush.bf16.msra.mxu2 %v1453_v1 }
  0x55   : > { %503 = vmatpush.bf16.msra.mxu0 %v1295_v46  ;;  %1050 = vmatpush.bf16.msra.mxu3 %v1461_v2 }
  0x56   : > { %552 = vmatpush.bf16.msra.mxu1 %v1299_v47 }
  0x58   : > { %504 = vmatmul.bf16.vlgmr.msra.gmra.mxu0 %v1426_v48  ;;  %1002 = vmatpush.bf16.msra.mxu2 %v1452_v4 }
  0x59   : > { %553 = vmatmul.bf16.vlgmr.msra.gmra.mxu1 %v1426_v48  ;;  %1051 = vmatpush.bf16.msra.mxu3 %v1460_v5 }
  0x5c   : > { %1003 = vmatpush.bf16.msra.mxu2 %v1451_v8 }
  0x5d   : > { %1052 = vmatpush.bf16.msra.mxu3 %v1459_v9 }
  0x60   : > { %1004 = vmatpush.bf16.msra.mxu2 %v1450_v13 }
  0x61   : > { %1053 = vmatpush.bf16.msra.mxu3 %v1458_v14 }
  0x68   : > { %509 = vmatmul.bf16.gmra.mxu0 %v1427_v49 }
  0x69   : > { %558 = vmatmul.bf16.gmra.mxu1 %v1427_v49 }
  0x78   : > { %514 = vmatmul.bf16.gmra.mxu0 %v1428_v50 }
  0x79   : > { %563 = vmatmul.bf16.gmra.mxu1 %v1428_v50 }
  0x88   : > { %519 = vmatmul.bf16.gmra.mxu0 %v1429_v51 }
  0x89   : > { %568 = vmatmul.bf16.gmra.mxu1 %v1429_v51 }
  0x98   : > { %524 = vmatmul.bf16.gmra.mxu0 %v1430_v52 }
  0x99   : > { %573 = vmatmul.bf16.gmra.mxu1 %v1430_v52 }
  0xa8   : > { %529 = vmatmul.bf16.gmra.mxu0 %v1431_v53 }
  0xa9   : > { %578 = vmatmul.bf16.gmra.mxu1 %v1431_v53 }
  0xb8   : > { %534 = vmatmul.bf16.gmra.mxu0 %v1432_v54 }
  0xb9   : > { %583 = vmatmul.bf16.gmra.mxu1 %v1432_v54 }
  0xc8   : > { %539 = vmatmul.bf16.gmra.mxu0 %v1433_v61 }
  0xc9   : > { %588 = vmatmul.bf16.gmra.mxu1 %v1433_v61 }
  0xd5   : > { %v505_v12 = vpop.f32.mrf.mxu0 }
  0xd6   : > { %v2044_v15 = vadd.f32 %v505_v12, %v2039_v10  ;;  %v554_v16 = vpop.f32.mrf.mxu1 }
  0xd7   : > { %v2047_v17 = vadd.f32 %v554_v16, %v2041_v11 }
  0xd8   : > { %v594_v18 = vmul.f32 %v2044_v15, %v2044_v15 }
  0xd9   : > { %v595_v19 = vmul.f32 %v2047_v17, %v2047_v17 }
  0xda   : > { %v626_v20 = vmul.f32 %v594_v18, %v2044_v15 }
  0xdb   : > { %v627_v21 = vmul.f32 %v595_v19, %v2047_v17 }
  0xdc   : > { %v658_v22 = vmul.f32 0.044715, %v626_v20 }
  0xdd   : > { %v659_v23 = vmul.f32 0.044715, %v627_v21  ;;  %v507_v24 = vpop.f32.mrf.mxu0 }
  0xde   : > { %v690_v25 = vadd.f32 %v658_v22, %v2044_v15  ;;  %v508_v26 = vadd.f32 %v507_v24, %v2039_v10  ;;  %v556_v27 = vpop.f32.mrf.mxu1 }
  0xdf   : > { %v691_v28 = vadd.f32 %v659_v23, %v2047_v17  ;;  %v557_v29 = vadd.f32 %v556_v27, %v2041_v11 }
  0xe0   : > { %v596_v30 = vmul.f32 %v508_v26, %v508_v26  ;;  %v722_v31 = vmul.f32 0.7978846, %v690_v25 }
  0xe1   : > { %v597_v32 = vmul.f32 %v557_v29, %v557_v29  ;;  %v723_v33 = vmul.f32 0.7978846, %v691_v28 }
  0xe2   : > { %v628_v34 = vmul.f32 %v596_v30, %v508_v26  ;;  %1597 = vtanh.f32 %v722_v31 }
  0xe3   : > { %v629_v35 = vmul.f32 %v597_v32, %v557_v29  ;;  %1599 = vtanh.f32 %v723_v33 }
  0xe4   : > { %v660_v36 = vmul.f32 0.044715, %v628_v34 }
  0xe5   : > { %v661_v37 = vmul.f32 0.044715, %v629_v35  ;;  %v510_v38 = vpop.f32.mrf.mxu0 }
  0xe6   : > { %v692_v39 = vadd.f32 %v660_v36, %v508_v26  ;;  %v2060_v40 = vadd.f32 %v510_v38, %v2039_v10  ;;  %v559_v41 = vpop.f32.mrf.mxu1 }
  0xe7   : > { %v693_v42 = vadd.f32 %v661_v37, %v557_v29  ;;  %v2063_v43 = vadd.f32 %v559_v41, %v2041_v11 }
  0xe8   : > { %v598_v44 = vmul.f32 %v2060_v40, %v2060_v40  ;;  %v724_v45 = vmul.f32 0.7978846, %v692_v39  ;;  %v1598_v48 = vpop.eup %1597 }
  0xe9   : > { %v599_v46 = vmul.f32 %v2063_v43, %v2063_v43  ;;  %v725_v47 = vmul.f32 0.7978846, %v693_v42  ;;  %v1600_v50 = vpop.eup %1599  ;;  %v786_v55 = vadd.f32 1.0, %v1598_v48 }
  0xea   : > { %v630_v49 = vmul.f32 %v598_v44, %v2060_v40  ;;  %1601 = vtanh.f32 %v724_v45  ;;  %v787_v59 = vadd.f32 1.0, %v1600_v50 }
  0xeb   : > { %v631_v51 = vmul.f32 %v599_v46, %v2063_v43  ;;  %1603 = vtanh.f32 %v725_v47  ;;  %v818_v4 = vmul.f32 0.5, %v786_v55 }
  0xec   : > { %v662_v52 = vmul.f32 0.044715, %v630_v49  ;;  %v819_v8 = vmul.f32 0.5, %v787_v59 }
  0xed   : > { %v663_v53 = vmul.f32 0.044715, %v631_v51  ;;  %v512_v54 = vpop.f32.mrf.mxu0  ;;  %v850_v19 = vmul.f32 %v818_v4, %v2044_v15 }
  0xee   : > { %v694_v56 = vadd.f32 %v662_v52, %v2060_v40  ;;  %v2073_v57 = vadd.f32 %v512_v54, %v2039_v10  ;;  %v561_v58 = vpop.f32.mrf.mxu1  ;;  %v851_v24 = vmul.f32 %v819_v8, %v2047_v17 }
  0xef   : > { %v695_v60 = vadd.f32 %v663_v53, %v2063_v43  ;;  %v2077_v61 = vadd.f32 %v561_v58, %v2041_v11 }
  0xf0   : > { %v1602_v62 = vpop.eup %1601  ;;  %v600_v63 = vmul.f32 %v2073_v57, %v2073_v57  ;;  %v726_v0 = vmul.f32 0.7978846, %v694_v56 }
  0xf1   : > { %v1604_v1 = vpop.eup %1603  ;;  %v601_v2 = vmul.f32 %v2077_v61, %v2077_v61  ;;  %v788_v3 = vadd.f32 1.0, %v1602_v62  ;;  %v727_v5 = vmul.f32 0.7978846, %v695_v60 }
  0xf2   : > { %v632_v6 = vmul.f32 %v600_v63, %v2073_v57  ;;  %v789_v7 = vadd.f32 1.0, %v1604_v1  ;;  %1605 = vtanh.f32 %v726_v0 }
  0xf3   : > { %v633_v9 = vmul.f32 %v601_v2, %v2077_v61  ;;  %v820_v12 = vmul.f32 0.5, %v788_v3  ;;  %1607 = vtanh.f32 %v727_v5 }
  0xf4   : > { %v664_v13 = vmul.f32 0.044715, %v632_v6  ;;  %v821_v14 = vmul.f32 0.5, %v789_v7 }
  0xf5   : > { %v665_v16 = vmul.f32 0.044715, %v633_v9  ;;  %v515_v18 = vpop.f32.mrf.mxu0  ;;  %v852_v20 = vmul.f32 %v820_v12, %v508_v26 }
  0xf6   : > { %v696_v21 = vadd.f32 %v664_v13, %v2073_v57  ;;  %v2088_v22 = vadd.f32 %v515_v18, %v2039_v10  ;;  %v564_v23 = vpop.f32.mrf.mxu1  ;;  %v853_v25 = vmul.f32 %v821_v14, %v557_v29 }
  0xf7   : > { %v697_v27 = vadd.f32 %v665_v16, %v2077_v61  ;;  %v2093_v28 = vadd.f32 %v564_v23, %v2041_v11  ;;  %v882_v30 = vpack.c.bf16 %v852_v20, %v850_v19 }
  0xf8   : > { %v602_v15 = vmul.f32 %v2088_v22, %v2088_v22  ;;  %v883_v26 = vpack.c.bf16 %v853_v25, %v851_v24  ;;  %v728_v31 = vmul.f32 0.7978846, %v696_v21  ;;  %v1606_v34 = vpop.eup %1605 }
  0xf9   : > { %v603_v32 = vmul.f32 %v2093_v28, %v2093_v28  ;;  %1005 = vmatmul.bf16.vlgmr.msra.gmra.mxu2 %v882_v30  ;;  %v729_v33 = vmul.f32 0.7978846, %v697_v27  ;;  %v1608_v29 = vpop.eup %1607  ;;  %v790_v39 = vadd.f32 1.0, %v1606_v34 }
  0xfa   : > { %v634_v17 = vmul.f32 %v602_v15, %v2088_v22  ;;  %1054 = vmatmul.bf16.vlgmr.msra.gmra.mxu3 %v883_v26  ;;  %1609 = vtanh.f32 %v728_v31  ;;  %v791_v45 = vadd.f32 1.0, %v1608_v29 }
  0xfb   : > { %v635_v35 = vmul.f32 %v603_v32, %v2093_v28  ;;  %1611 = vtanh.f32 %v729_v33  ;;  %v822_v54 = vmul.f32 0.5, %v790_v39 }
  0xfc   : > { %v666_v36 = vmul.f32 0.044715, %v634_v17  ;;  %v823_v59 = vmul.f32 0.5, %v791_v45 }
  0xfd   : > { %v667_v37 = vmul.f32 0.044715, %v635_v35  ;;  %v517_v38 = vpop.f32.mrf.mxu0  ;;  %v854_v3 = vmul.f32 %v822_v54, %v2060_v40 }
  0xfe   : > { %v698_v41 = vadd.f32 %v666_v36, %v2088_v22  ;;  %v2103_v42 = vadd.f32 %v517_v38, %v2039_v10  ;;  %v566_v44 = vpop.f32.mrf.mxu1  ;;  %v855_v8 = vmul.f32 %v823_v59, %v2063_v43 }
  0xff   : > { %v699_v46 = vadd.f32 %v667_v37, %v2093_v28  ;;  %v2107_v47 = vadd.f32 %v566_v44, %v2041_v11 }
 0x100   : > { %v1610_v48 = vpop.eup %1609  ;;  %v604_v49 = vmul.f32 %v2103_v42, %v2103_v42  ;;  %v730_v50 = vmul.f32 0.7978846, %v698_v41 }
 0x101   : > { %v1612_v51 = vpop.eup %1611  ;;  %v605_v52 = vmul.f32 %v2107_v47, %v2107_v47  ;;  %v792_v53 = vadd.f32 1.0, %v1610_v48  ;;  %v731_v55 = vmul.f32 0.7978846, %v699_v46 }
 0x102   : > { %v636_v56 = vmul.f32 %v604_v49, %v2103_v42  ;;  %v793_v58 = vadd.f32 1.0, %v1612_v51  ;;  %1613 = vtanh.f32 %v730_v50 }
 0x103   : > { %v637_v60 = vmul.f32 %v605_v52, %v2107_v47  ;;  %v824_v62 = vmul.f32 0.5, %v792_v53  ;;  %1615 = vtanh.f32 %v731_v55 }
 0x104   : > { %v668_v63 = vmul.f32 0.044715, %v636_v56  ;;  %v825_v0 = vmul.f32 0.5, %v793_v58 }
 0x105   : > { %v669_v1 = vmul.f32 0.044715, %v637_v60  ;;  %v520_v2 = vpop.f32.mrf.mxu0  ;;  %v856_v4 = vmul.f32 %v824_v62, %v2073_v57 }
 0x106   : > { %v700_v5 = vadd.f32 %v668_v63, %v2103_v42  ;;  %v2119_v6 = vadd.f32 %v520_v2, %v2039_v10  ;;  %v569_v7 = vpop.f32.mrf.mxu1  ;;  %v857_v9 = vmul.f32 %v825_v0, %v2077_v61 }
 0x107   : > { %v701_v12 = vadd.f32 %v669_v1, %v2107_v47  ;;  %v2125_v13 = vadd.f32 %v569_v7, %v2041_v11  ;;  %v884_v14 = vpack.c.bf16 %v856_v4, %v854_v3 }
 0x108   : > { %v606_v40 = vmul.f32 %v2119_v6, %v2119_v6  ;;  %v885_v57 = vpack.c.bf16 %v857_v9, %v855_v8  ;;  %v732_v16 = vmul.f32 0.7978846, %v700_v5  ;;  %v1614_v20 = vpop.eup %1613 }
 0x109   : > { %v607_v18 = vmul.f32 %v2125_v13, %v2125_v13  ;;  %1010 = vmatmul.bf16.gmra.mxu2 %v884_v14  ;;  %v733_v19 = vmul.f32 0.7978846, %v701_v12  ;;  %v1616_v61 = vpop.eup %1615  ;;  %v794_v27 = vadd.f32 1.0, %v1614_v20 }
 0x10a   : > { %v638_v43 = vmul.f32 %v606_v40, %v2119_v6  ;;  %1059 = vmatmul.bf16.gmra.mxu3 %v885_v57  ;;  %1617 = vtanh.f32 %v732_v16  ;;  %v795_v31 = vadd.f32 1.0, %v1616_v61 }
 0x10b   : > { %v639_v21 = vmul.f32 %v607_v18, %v2125_v13  ;;  %1619 = vtanh.f32 %v733_v19  ;;  %v826_v38 = vmul.f32 0.5, %v794_v27 }
 0x10c   : > { %v670_v23 = vmul.f32 0.044715, %v638_v43  ;;  %v827_v45 = vmul.f32 0.5, %v795_v31 }
 0x10d   : > { %v671_v24 = vmul.f32 0.044715, %v639_v21  ;;  %v522_v25 = vpop.f32.mrf.mxu0  ;;  %v858_v53 = vmul.f32 %v826_v38, %v2088_v22 }
 0x10e   : > { %v702_v30 = vadd.f32 %v670_v23, %v2119_v6  ;;  %v2135_v15 = vadd.f32 %v522_v25, %v2039_v10  ;;  %v571_v26 = vpop.f32.mrf.mxu1  ;;  %v859_v59 = vmul.f32 %v827_v45, %v2093_v28 }
 0x10f   : > { %v703_v32 = vadd.f32 %v671_v24, %v2125_v13  ;;  %v2139_v33 = vadd.f32 %v571_v26, %v2041_v11 }
 0x110   : > { %v1618_v34 = vpop.eup %1617  ;;  %v608_v17 = vmul.f32 %v2135_v15, %v2135_v15  ;;  %v734_v29 = vmul.f32 0.7978846, %v702_v30 }
 0x111   : > { %v1620_v35 = vpop.eup %1619  ;;  %v609_v36 = vmul.f32 %v2139_v33, %v2139_v33  ;;  %v796_v37 = vadd.f32 1.0, %v1618_v34  ;;  %v735_v39 = vmul.f32 0.7978846, %v703_v32 }
 0x112   : > { %v640_v41 = vmul.f32 %v608_v17, %v2135_v15  ;;  %v797_v44 = vadd.f32 1.0, %v1620_v35  ;;  %1621 = vtanh.f32 %v734_v29 }
 0x113   : > { %v641_v46 = vmul.f32 %v609_v36, %v2139_v33  ;;  %v828_v48 = vmul.f32 0.5, %v796_v37  ;;  %1623 = vtanh.f32 %v735_v39 }
 0x114   : > { %v672_v49 = vmul.f32 0.044715, %v640_v41  ;;  %v829_v50 = vmul.f32 0.5, %v797_v44 }
 0x115   : > { %v673_v51 = vmul.f32 0.044715, %v641_v46  ;;  %v525_v52 = vpop.f32.mrf.mxu0  ;;  %v860_v54 = vmul.f32 %v828_v48, %v2103_v42 }
 0x116   : > { %v704_v55 = vadd.f32 %v672_v49, %v2135_v15  ;;  %v2151_v56 = vadd.f32 %v525_v52, %v2039_v10  ;;  %v574_v58 = vpop.f32.mrf.mxu1  ;;  %v861_v60 = vmul.f32 %v829_v50, %v2107_v47 }
 0x117   : > { %v705_v62 = vadd.f32 %v673_v51, %v2139_v33  ;;  %v2157_v63 = vadd.f32 %v574_v58, %v2041_v11  ;;  %v886_v0 = vpack.c.bf16 %v860_v54, %v858_v53 }
 0x118   : > { %v610_v22 = vmul.f32 %v2151_v56, %v2151_v56  ;;  %v887_v42 = vpack.c.bf16 %v861_v60, %v859_v59  ;;  %v736_v1 = vmul.f32 0.7978846, %v704_v55  ;;  %v1622_v4 = vpop.eup %1621 }
 0x119   : > { %v611_v2 = vmul.f32 %v2157_v63, %v2157_v63  ;;  %1015 = vmatmul.bf16.gmra.mxu2 %v886_v0  ;;  %v737_v3 = vmul.f32 0.7978846, %v705_v62  ;;  %v1624_v47 = vpop.eup %1623  ;;  %v798_v12 = vadd.f32 1.0, %v1622_v4 }
 0x11a   : > { %v642_v28 = vmul.f32 %v610_v22, %v2151_v56  ;;  %1064 = vmatmul.bf16.gmra.mxu3 %v887_v42  ;;  %1625 = vtanh.f32 %v736_v1  ;;  %v799_v16 = vadd.f32 1.0, %v1624_v47 }
 0x11b   : > { %v643_v5 = vmul.f32 %v611_v2, %v2157_v63  ;;  %1627 = vtanh.f32 %v737_v3  ;;  %v830_v25 = vmul.f32 0.5, %v798_v12 }
 0x11c   : > { %v674_v7 = vmul.f32 0.044715, %v642_v28  ;;  %v831_v31 = vmul.f32 0.5, %v799_v16 }
 0x11d   : > { %v675_v8 = vmul.f32 0.044715, %v643_v5  ;;  %v527_v9 = vpop.f32.mrf.mxu0  ;;  %v862_v37 = vmul.f32 %v830_v25, %v2119_v6 }
 0x11e   : > { %v706_v14 = vadd.f32 %v674_v7, %v2151_v56  ;;  %v2167_v40 = vadd.f32 %v527_v9, %v2039_v10  ;;  %v576_v57 = vpop.f32.mrf.mxu1  ;;  %v863_v45 = vmul.f32 %v831_v31, %v2125_v13 }
 0x11f   : > { %v707_v18 = vadd.f32 %v675_v8, %v2157_v63  ;;  %v2171_v19 = vadd.f32 %v576_v57, %v2041_v11 }
 0x120   : > { %v1626_v20 = vpop.eup %1625  ;;  %v612_v43 = vmul.f32 %v2167_v40, %v2167_v40  ;;  %v738_v61 = vmul.f32 0.7978846, %v706_v14 }
 0x121   : > { %v1628_v21 = vpop.eup %1627  ;;  %v613_v23 = vmul.f32 %v2171_v19, %v2171_v19  ;;  %v800_v24 = vadd.f32 1.0, %v1626_v20  ;;  %v739_v27 = vmul.f32 0.7978846, %v707_v18 }
 0x122   : > { %v644_v30 = vmul.f32 %v612_v43, %v2167_v40  ;;  %v801_v26 = vadd.f32 1.0, %v1628_v21  ;;  %1629 = vtanh.f32 %v738_v61 }
 0x123   : > { %v645_v32 = vmul.f32 %v613_v23, %v2171_v19  ;;  %v832_v34 = vmul.f32 0.5, %v800_v24  ;;  %1631 = vtanh.f32 %v739_v27 }
 0x124   : > { %v676_v17 = vmul.f32 0.044715, %v644_v30  ;;  %v833_v29 = vmul.f32 0.5, %v801_v26 }
 0x125   : > { %v677_v35 = vmul.f32 0.044715, %v645_v32  ;;  %v530_v36 = vpop.f32.mrf.mxu0  ;;  %v864_v38 = vmul.f32 %v832_v34, %v2135_v15 }
 0x126   : > { %v708_v39 = vadd.f32 %v676_v17, %v2167_v40  ;;  %v2183_v41 = vadd.f32 %v530_v36, %v2039_v10  ;;  %v579_v44 = vpop.f32.mrf.mxu1  ;;  %v865_v46 = vmul.f32 %v833_v29, %v2139_v33 }
 0x127   : > { %v709_v48 = vadd.f32 %v677_v35, %v2171_v19  ;;  %v2189_v49 = vadd.f32 %v579_v44, %v2041_v11  ;;  %v888_v50 = vpack.c.bf16 %v864_v38, %v862_v37 }
 0x128   : > { %v614_v6 = vmul.f32 %v2183_v41, %v2183_v41  ;;  %v889_v15 = vpack.c.bf16 %v865_v46, %v863_v45  ;;  %v740_v51 = vmul.f32 0.7978846, %v708_v39  ;;  %v1630_v54 = vpop.eup %1629 }
 0x129   : > { %v615_v52 = vmul.f32 %v2189_v49, %v2189_v49  ;;  %1020 = vmatmul.bf16.gmra.mxu2 %v888_v50  ;;  %v741_v53 = vmul.f32 0.7978846, %v709_v48  ;;  %v1632_v33 = vpop.eup %1631  ;;  %v802_v62 = vadd.f32 1.0, %v1630_v54 }
 0x12a   : > { %v646_v13 = vmul.f32 %v614_v6, %v2183_v41  ;;  %1069 = vmatmul.bf16.gmra.mxu3 %v889_v15  ;;  %1633 = vtanh.f32 %v740_v51  ;;  %v803_v1 = vadd.f32 1.0, %v1632_v33 }
 0x12b   : > { %v647_v55 = vmul.f32 %v615_v52, %v2189_v49  ;;  %1635 = vtanh.f32 %v741_v53  ;;  %v834_v9 = vmul.f32 0.5, %v802_v62 }
 0x12c   : > { %v678_v58 = vmul.f32 0.044715, %v646_v13  ;;  %v835_v16 = vmul.f32 0.5, %v803_v1 }
 0x12d   : > { %v679_v59 = vmul.f32 0.044715, %v647_v55  ;;  %v532_v60 = vpop.f32.mrf.mxu0  ;;  %v866_v24 = vmul.f32 %v834_v9, %v2151_v56 }
 0x12e   : > { %v710_v0 = vadd.f32 %v678_v58, %v2183_v41  ;;  %v2199_v22 = vadd.f32 %v532_v60, %v2039_v10  ;;  %v581_v42 = vpop.f32.mrf.mxu1  ;;  %v867_v31 = vmul.f32 %v835_v16, %v2157_v63 }
 0x12f   : > { %v711_v2 = vadd.f32 %v679_v59, %v2189_v49  ;;  %v2203_v3 = vadd.f32 %v581_v42, %v2041_v11 }
 0x130   : > { %v1634_v4 = vpop.eup %1633  ;;  %v616_v28 = vmul.f32 %v2199_v22, %v2199_v22  ;;  %v742_v47 = vmul.f32 0.7978846, %v710_v0 }
 0x131   : > { %v1636_v5 = vpop.eup %1635  ;;  %v617_v7 = vmul.f32 %v2203_v3, %v2203_v3  ;;  %v804_v8 = vadd.f32 1.0, %v1634_v4  ;;  %v743_v12 = vmul.f32 0.7978846, %v711_v2 }
 0x132   : > { %v648_v14 = vmul.f32 %v616_v28, %v2199_v22  ;;  %v805_v57 = vadd.f32 1.0, %v1636_v5  ;;  %1637 = vtanh.f32 %v742_v47 }
 0x133   : > { %v649_v18 = vmul.f32 %v617_v7, %v2203_v3  ;;  %v836_v20 = vmul.f32 0.5, %v804_v8  ;;  %1639 = vtanh.f32 %v743_v12 }
 0x134   : > { %v680_v43 = vmul.f32 0.044715, %v648_v14  ;;  %v837_v61 = vmul.f32 0.5, %v805_v57 }
 0x135   : > { %v681_v21 = vmul.f32 0.044715, %v649_v18  ;;  %v535_v23 = vpop.f32.mrf.mxu0  ;;  %v868_v25 = vmul.f32 %v836_v20, %v2167_v40 }
 0x136   : > { %v712_v27 = vadd.f32 %v680_v43, %v2199_v22  ;;  %v2215_v30 = vadd.f32 %v535_v23, %v2039_v10  ;;  %v584_v26 = vpop.f32.mrf.mxu1  ;;  %v869_v32 = vmul.f32 %v837_v61, %v2171_v19 }
 0x137   : > { %v713_v34 = vadd.f32 %v681_v21, %v2203_v3  ;;  %v2221_v17 = vadd.f32 %v584_v26, %v2041_v11  ;;  %v890_v29 = vpack.c.bf16 %v868_v25, %v866_v24 }
 0x138   : > { %v618_v56 = vmul.f32 %v2215_v30, %v2215_v30  ;;  %v891_v40 = vpack.c.bf16 %v869_v32, %v867_v31  ;;  %v744_v35 = vmul.f32 0.7978846, %v712_v27  ;;  %v1638_v38 = vpop.eup %1637 }
 0x139   : > { %v619_v36 = vmul.f32 %v2221_v17, %v2221_v17  ;;  %1025 = vmatmul.bf16.gmra.mxu2 %v890_v29  ;;  %v745_v37 = vmul.f32 0.7978846, %v713_v34  ;;  %v1640_v19 = vpop.eup %1639  ;;  %v806_v48 = vadd.f32 1.0, %v1638_v38 }
 0x13a   : > { %v650_v63 = vmul.f32 %v618_v56, %v2215_v30  ;;  %1074 = vmatmul.bf16.gmra.mxu3 %v891_v40  ;;  %1641 = vtanh.f32 %v744_v35  ;;  %v807_v51 = vadd.f32 1.0, %v1640_v19 }
 0x13b   : > { %v651_v39 = vmul.f32 %v619_v36, %v2221_v17  ;;  %1643 = vtanh.f32 %v745_v37  ;;  %v838_v60 = vmul.f32 0.5, %v806_v48 }
 0x13c   : > { %v682_v44 = vmul.f32 0.044715, %v650_v63  ;;  %v839_v1 = vmul.f32 0.5, %v807_v51 }
 0x13d   : > { %v683_v45 = vmul.f32 0.044715, %v651_v39  ;;  %v537_v46 = vpop.f32.mrf.mxu0  ;;  %v870_v8 = vmul.f32 %v838_v60, %v2183_v41 }
 0x13e   : > { %v714_v50 = vadd.f32 %v682_v44, %v2215_v30  ;;  %v2231_v6 = vadd.f32 %v537_v46, %v2039_v10  ;;  %v586_v15 = vpop.f32.mrf.mxu1  ;;  %v871_v16 = vmul.f32 %v839_v1, %v2189_v49 }
 0x13f   : > { %v715_v52 = vadd.f32 %v683_v45, %v2221_v17  ;;  %v2235_v53 = vadd.f32 %v586_v15, %v2041_v11 }
 0x140   : > { %v1642_v54 = vpop.eup %1641  ;;  %v620_v13 = vmul.f32 %v2231_v6, %v2231_v6  ;;  %v746_v33 = vmul.f32 0.7978846, %v714_v50 }
 0x141   : > { %v1644_v55 = vpop.eup %1643  ;;  %v621_v58 = vmul.f32 %v2235_v53, %v2235_v53  ;;  %v808_v59 = vadd.f32 1.0, %v1642_v54  ;;  %v747_v62 = vmul.f32 0.7978846, %v715_v52 }
 0x142   : > { %v652_v0 = vmul.f32 %v620_v13, %v2231_v6  ;;  %v809_v42 = vadd.f32 1.0, %v1644_v55  ;;  %1645 = vtanh.f32 %v746_v33 }
 0x143   : > { %v653_v2 = vmul.f32 %v621_v58, %v2235_v53  ;;  %v840_v4 = vmul.f32 0.5, %v808_v59  ;;  %1647 = vtanh.f32 %v747_v62 }
 0x144   : > { %v684_v28 = vmul.f32 0.044715, %v652_v0  ;;  %v841_v47 = vmul.f32 0.5, %v809_v42 }
 0x145   : > { %v685_v5 = vmul.f32 0.044715, %v653_v2  ;;  %v540_v7 = vpop.f32.mrf.mxu0  ;;  %v872_v9 = vmul.f32 %v840_v4, %v2199_v22 }
 0x146   : > { %v716_v12 = vadd.f32 %v684_v28, %v2231_v6  ;;  %v2247_v14 = vadd.f32 %v540_v7, %v2039_v10  ;;  %v589_v57 = vpop.f32.mrf.mxu1  ;;  %v873_v18 = vmul.f32 %v841_v47, %v2203_v3 }
 0x147   : > { %v717_v20 = vadd.f32 %v685_v5, %v2235_v53  ;;  %v2253_v43 = vadd.f32 %v589_v57, %v2041_v11  ;;  %v892_v61 = vpack.c.bf16 %v872_v9, %v870_v8 }
 0x148   : > { %v622_v41 = vmul.f32 %v2247_v14, %v2247_v14  ;;  %v893_v22 = vpack.c.bf16 %v873_v18, %v871_v16  ;;  %v748_v21 = vmul.f32 0.7978846, %v716_v12  ;;  %v1646_v25 = vpop.eup %1645 }
 0x149   : > { %v623_v23 = vmul.f32 %v2253_v43, %v2253_v43  ;;  %1030 = vmatmul.bf16.gmra.mxu2 %v892_v61  ;;  %v749_v24 = vmul.f32 0.7978846, %v717_v20  ;;  %v1648_v3 = vpop.eup %1647  ;;  %v810_v34 = vadd.f32 1.0, %v1646_v25 }
 0x14a   : > { %v654_v49 = vmul.f32 %v622_v41, %v2247_v14  ;;  %1079 = vmatmul.bf16.gmra.mxu3 %v893_v22  ;;  %1649 = vtanh.f32 %v748_v21  ;;  %v811_v35 = vadd.f32 1.0, %v1648_v3  ;;  %v898_v22 = vld [vmem:[%s2342_s4] sm:$0x1] }
 0x14b   : > { %v655_v27 = vmul.f32 %v623_v23, %v2253_v43  ;;  %1651 = vtanh.f32 %v749_v24  ;;  %v842_v46 = vmul.f32 0.5, %v810_v34  ;;  %v899_v21 = vunpack.c.l.bf16 %v898_v22 }
 0x14c   : > { %v686_v26 = vmul.f32 0.044715, %v654_v49  ;;  %v843_v51 = vmul.f32 0.5, %v811_v35 }
 0x14d   : > { %v687_v31 = vmul.f32 0.044715, %v655_v27  ;;  %v542_v32 = vpop.f32.mrf.mxu0  ;;  %v874_v55 = vmul.f32 %v842_v46, %v2215_v30  ;;  %v2274_v25 = vperm.slane %v899_v21, 0 }
 0x14e   : > { %v718_v29 = vadd.f32 %v686_v26, %v2247_v14  ;;  %v543_v56 = vadd.f32 %v542_v32, %v2039_v10  ;;  %v591_v40 = vpop.f32.mrf.mxu1  ;;  %v875_v59 = vmul.f32 %v843_v51, %v2221_v17 }
 0x14f   : > { %v719_v36 = vadd.f32 %v687_v31, %v2253_v43  ;;  %v592_v37 = vadd.f32 %v591_v40, %v2041_v11 }
 0x150   : > { %v1650_v38 = vpop.eup %1649  ;;  %v624_v63 = vmul.f32 %v543_v56, %v543_v56  ;;  %v750_v19 = vmul.f32 0.7978846, %v718_v29 }
 0x151   : > { %v1652_v39 = vpop.eup %1651  ;;  %v625_v44 = vmul.f32 %v592_v37, %v592_v37  ;;  %v812_v45 = vadd.f32 1.0, %v1650_v38  ;;  %v751_v48 = vmul.f32 0.7978846, %v719_v36 }
 0x152   : > { %v656_v50 = vmul.f32 %v624_v63, %v543_v56  ;;  %v813_v15 = vadd.f32 1.0, %v1652_v39  ;;  %1653 = vtanh.f32 %v750_v19 }
 0x153   : > { %v657_v52 = vmul.f32 %v625_v44, %v592_v37  ;;  %v844_v54 = vmul.f32 0.5, %v812_v45  ;;  %1655 = vtanh.f32 %v751_v48 }
 0x154   : > { %v688_v10 = vmul.f32 0.044715, %v656_v50  ;;  %v845_v13 = vmul.f32 0.5, %v813_v15 }
 0x155   : > { %v689_v33 = vmul.f32 0.044715, %v657_v52  ;;  %v876_v11 = vmul.f32 %v844_v54, %v2231_v6 }
 0x156   : > { %v720_v58 = vadd.f32 %v688_v10, %v543_v56  ;;  %v877_v60 = vmul.f32 %v845_v13, %v2235_v53 }
 0x157   : > { %v721_v62 = vadd.f32 %v689_v33, %v592_v37  ;;  %v894_v0 = vpack.c.bf16 %v876_v11, %v874_v55 }
 0x158   : > { %v895_v42 = vpack.c.bf16 %v877_v60, %v875_v59  ;;  %v752_v1 = vmul.f32 0.7978846, %v720_v58  ;;  %v1654_v4 = vpop.eup %1653 }
 0x159   : > { %1035 = vmatmul.bf16.gmra.mxu2 %v894_v0  ;;  %v753_v2 = vmul.f32 0.7978846, %v721_v62  ;;  %v1656_v28 = vpop.eup %1655  ;;  %v814_v30 = vadd.f32 1.0, %v1654_v4 }
 0x15a   : > { %1084 = vmatmul.bf16.gmra.mxu3 %v895_v42  ;;  %1657 = vtanh.f32 %v752_v1  ;;  %v815_v47 = vadd.f32 1.0, %v1656_v28 }
 0x15b   : > { %1659 = vtanh.f32 %v753_v2  ;;  %v846_v8 = vmul.f32 0.5, %v814_v30 }
 0x15c   : > { %v847_v9 = vmul.f32 0.5, %v815_v47 }
 0x15d   : > { %v878_v57 = vmul.f32 %v846_v8, %v2247_v14 }
 0x15e   : > { %v879_v18 = vmul.f32 %v847_v9, %v2253_v43 }
 0x160   : > { %v1658_v6 = vpop.eup %1657 }
 0x161   : > { %v1660_v5 = vpop.eup %1659  ;;  %v816_v7 = vadd.f32 1.0, %v1658_v6 }
 0x162   : > { %v817_v17 = vadd.f32 1.0, %v1660_v5 }
 0x163   : > { %v848_v53 = vmul.f32 0.5, %v816_v7 }
 0x164   : > { %v849_v12 = vmul.f32 0.5, %v817_v17 }
 0x165   : > { %v880_v16 = vmul.f32 %v848_v53, %v543_v56 }
 0x166   : > { %v881_v20 = vmul.f32 %v849_v12, %v592_v37 }
 0x167   : > { %v896_v61 = vpack.c.bf16 %v880_v16, %v878_v57 }
 0x168   : > { %v897_v41 = vpack.c.bf16 %v881_v20, %v879_v18 }
 0x169   : > { %1040 = vmatmul.bf16.gmra.mxu2 %v896_v61 }
 0x16a   : > { %1089 = vmatmul.bf16.gmra.mxu3 %v897_v41 }
 0x17c   : > { %v1006_v23 = vpop.f32.mrf.mxu2 }
 0x17d   : > { %v1055_v24 = vpop.f32.mrf.mxu3  ;;  %v1007_v14 = vadd.f32 %v1006_v23, %v2274_v25 }
 0x17f   : > { %v1056_v27 = vadd.f32 %v1055_v24, %v1007_v14 }
 0x184   : > { %v1008_v49 = vpop.f32.mrf.mxu2 }
 0x185   : > { %v1009_v43 = vadd.f32 %v1008_v49, %v2274_v25  ;;  %v1057_v3 = vpop.f32.mrf.mxu3 }
 0x187   : > { %v1058_v26 = vadd.f32 %v1057_v3, %v1009_v43 }
 0x189   : > { %v1470_v31 = vpack.c.bf16 %v1058_v26, %v1056_v27 }
 0x18b   : > { %1471 = vst [vmem:[%s2280_s28] sm:$0xff] %v1470_v31  }
 0x18c   : > { %v1011_v32 = vpop.f32.mrf.mxu2 }
 0x18d   : > { %v1060_v34 = vpop.f32.mrf.mxu3  ;;  %v1012_v29 = vadd.f32 %v1011_v32, %v2274_v25 }
 0x18f   : > { %v1061_v36 = vadd.f32 %v1060_v34, %v1012_v29 }
 0x194   : > { %v1013_v56 = vpop.f32.mrf.mxu2 }
 0x195   : > { %v1014_v40 = vadd.f32 %v1013_v56, %v2274_v25  ;;  %v1062_v35 = vpop.f32.mrf.mxu3 }
 0x197   : > { %v1063_v37 = vadd.f32 %v1062_v35, %v1014_v40 }
 0x199   : > { %v1475_v38 = vpack.c.bf16 %v1063_v37, %v1061_v36 }
 0x19b   : > { %1507 = vst [vmem:[%s2280_s28 + $0x8] sm:$0xff] %v1475_v38  }
 0x19c   : > { %v1016_v63 = vpop.f32.mrf.mxu2 }
 0x19d   : > { %v1065_v19 = vpop.f32.mrf.mxu3  ;;  %v1017_v39 = vadd.f32 %v1016_v63, %v2274_v25 }
 0x19f   : > { %v1066_v48 = vadd.f32 %v1065_v19, %v1017_v39 }
 0x1a4   : > { %v1018_v44 = vpop.f32.mrf.mxu2 }
 0x1a5   : > { %v1019_v45 = vadd.f32 %v1018_v44, %v2274_v25  ;;  %v1067_v46 = vpop.f32.mrf.mxu3 }
 0x1a7   : > { %v1068_v50 = vadd.f32 %v1067_v46, %v1019_v45 }
 0x1a9   : > { %v1480_v15 = vpack.c.bf16 %v1068_v50, %v1066_v48 }
 0x1ab   : > { %1508 = vst [vmem:[%s2280_s28 + $0x10] sm:$0xff] %v1480_v15  }
 0x1ac   : > { %v1021_v51 = vpop.f32.mrf.mxu2 }
 0x1ad   : > { %v1070_v52 = vpop.f32.mrf.mxu3  ;;  %v1022_v54 = vadd.f32 %v1021_v51, %v2274_v25 }
 0x1af   : > { %v1071_v55 = vadd.f32 %v1070_v52, %v1022_v54 }
 0x1b4   : > { %v1023_v10 = vpop.f32.mrf.mxu2 }
 0x1b5   : > { %v1024_v13 = vadd.f32 %v1023_v10, %v2274_v25  ;;  %v1072_v33 = vpop.f32.mrf.mxu3 }
 0x1b7   : > { %v1073_v11 = vadd.f32 %v1072_v33, %v1024_v13 }
 0x1b9   : > { %v1485_v58 = vpack.c.bf16 %v1073_v11, %v1071_v55 }
 0x1bb   : > { %1509 = vst [vmem:[%s2280_s28 + $0x18] sm:$0xff] %v1485_v58  }
 0x1bc   : > { %v1026_v59 = vpop.f32.mrf.mxu2 }
 0x1bd   : > { %v1075_v60 = vpop.f32.mrf.mxu3  ;;  %v1027_v62 = vadd.f32 %v1026_v59, %v2274_v25 }
 0x1bf   : > { %v1076_v2 = vadd.f32 %v1075_v60, %v1027_v62 }
 0x1c4   : > { %v1028_v0 = vpop.f32.mrf.mxu2 }
 0x1c5   : > { %v1029_v42 = vadd.f32 %v1028_v0, %v2274_v25  ;;  %v1077_v1 = vpop.f32.mrf.mxu3 }
 0x1c7   : > { %v1078_v4 = vadd.f32 %v1077_v1, %v1029_v42 }
 0x1c9   : > { %v1490_v28 = vpack.c.bf16 %v1078_v4, %v1076_v2 }
 0x1cb   : > { %1510 = vst [vmem:[%s2280_s28 + $0x20] sm:$0xff] %v1490_v28  }
 0x1cc   : > { %v1031_v30 = vpop.f32.mrf.mxu2 }
 0x1cd   : > { %v1080_v47 = vpop.f32.mrf.mxu3  ;;  %v1032_v6 = vadd.f32 %v1031_v30, %v2274_v25 }
 0x1cf   : > { %v1081_v17 = vadd.f32 %v1080_v47, %v1032_v6 }
 0x1d4   : > { %v1033_v5 = vpop.f32.mrf.mxu2 }
 0x1d5   : > { %v1034_v7 = vadd.f32 %v1033_v5, %v2274_v25  ;;  %v1082_v8 = vpop.f32.mrf.mxu3 }
 0x1d7   : > { %v1083_v9 = vadd.f32 %v1082_v8, %v1034_v7 }
 0x1d9   : > { %v1495_v53 = vpack.c.bf16 %v1083_v9, %v1081_v17 }
 0x1db   : > { %1511 = vst [vmem:[%s2280_s28 + $0x28] sm:$0xff] %v1495_v53  }
 0x1dc   : > { %v1036_v12 = vpop.f32.mrf.mxu2 }
 0x1dd   : > { %v1085_v57 = vpop.f32.mrf.mxu3  ;;  %v1037_v16 = vadd.f32 %v1036_v12, %v2274_v25 }
 0x1df   : > { %v1086_v41 = vadd.f32 %v1085_v57, %v1037_v16 }
 0x1e4   : > { %v1038_v18 = vpop.f32.mrf.mxu2 }
 0x1e5   : > { %v1039_v20 = vadd.f32 %v1038_v18, %v2274_v25  ;;  %v1087_v61 = vpop.f32.mrf.mxu3 }
 0x1e7   : > { %v1088_v22 = vadd.f32 %v1087_v61, %v1039_v20 }
 0x1e9   : > { %v1500_v21 = vpack.c.bf16 %v1088_v22, %v1086_v41 }
 0x1eb   : > { %1512 = vst [vmem:[%s2280_s28 + $0x30] sm:$0xff] %v1500_v21  }
 0x1ec   : > { %v1041_v23 = vpop.f32.mrf.mxu2 }
 0x1ed   : > { %v1090_v24 = vpop.f32.mrf.mxu3  ;;  %v1042_v14 = vadd.f32 %v1041_v23, %v2274_v25 }
 0x1ef   : > { %v1091_v27 = vadd.f32 %v1090_v24, %v1042_v14 }
 0x1f4   : > { %v1043_v49 = vpop.f32.mrf.mxu2 }
 0x1f5   : > { %v1044_v43 = vadd.f32 %v1043_v49, %v2274_v25  ;;  %v1092_v3 = vpop.f32.mrf.mxu3 }
 0x1f7   : > { %v1093_v26 = vadd.f32 %v1092_v3, %v1044_v43 }
 0x1f9   : > { %v1505_v31 = vpack.c.bf16 %v1093_v26, %v1091_v27 }
 0x1fb   : > { %1513 = vst [vmem:[%s2280_s28 + $0x38] sm:$0xff] %v1505_v31  }
 0x1fc   : > { %1808 = shalt.err (!%p1805_p10)
}
 0x1fd   : > { %s1864_s17 = smov 64   ;;  %s1865_s29 = smov 4  }
 0x1fe   : > { %1528 = dma.vmem_to_hbm [thread:$0]  (%p1981_p3), %s1141_s13, 1024, %s1143_s12, %s1128_s22, %s1864_s17, %s1864_s17, %s1865_s29  }
 0x1ff PF: > { %s1157_s28 = sand.u32 1, %s1843_s18   ;;  %p2352_p12 = scmp.ge.s32.totalorder %s1855_s21, 2 }
 0x200   : > { %s1158_s16 = scalar_lea.sflag [#allocation4], %s1157_s28 }
 0x201   : > { %p1545_p13 = pnand %p2352_p12, %p1931_p6 }
 0x203   : > { %p1546_p0 = pneg %p1545_p13 }
 0x205   : > { %1838 = dma.done.wait (%p1546_p0), %s1158_s16, 1024  }
 0x206   : > { %1840 = vsyncadd (%p1546_p0), %s1158_s16, 4294966272  ;;  %p20_p5 = scmp.ge.s32.totalorder %s1968_s30, 4   ;;  %s2353_s18 = smov %s1847_s19 }
 0x207   : > { %s2354_s19 = smov %s1851_s20  ;;  %s2355_s20 = smov %s1977_s9 }
 0x208   : > { %s2356_s21 = smov %s1968_s30  ;;  %22 = sbr.rel (!%p20_p5) target bundleno = 7 (0x7), region = 97 }
 0x20d   :  { %1164 = vsyncpa [#allocation3], 1 }
 0x20e   :  { %1166 = vsyncpa [#allocation3 + $0x1], 1 }
 0x20f   :  { %1167 = vsyncpa [#allocation6], 1 }
 0x210   :  { %1168 = vsyncpa [#allocation9], 1 }
 0x211   :  { %1169 = vsyncpa [#allocation4], 1 }
 0x212   :  { %1171 = vsyncpa [#allocation4 + $0x1], 1 }

</bundles_post_ra>
